<compile_context>
chip_gen: v6e
topology: v6e:2x2x1
jax: 0.10.0
libtpu: 0.0.40
codegen_flags: <defaults>
</compile_context>

<pallas_src>
import functools

import jax
import jax.numpy as jnp
from jax.experimental import pallas as pl
from jax.experimental.pallas import tpu as pltpu


# ----------------------------------------------------------------------------
# Fused, batched Pallas kernel: conv stack + Linear(1,1) + Sigmoid
# ----------------------------------------------------------------------------
def _fused_forward_kernel(a_ref, x_ref, theta_ref, o_ref, *,
                          layer_meta, lin_row, final_linear, final_sigmoid,
                          compute_dtype):
    """One grid step = one graph of the batch.

    a_ref:     [N, N]          normalized adjacency (shared across the batch)
    x_ref:     [1, N, F_in0]   this graph's node features
    theta_ref: [R, C]          every layer's packed weights + lin scalars
    o_ref:     [1, N, F_last]
    """
    f32 = jnp.float32
    A = a_ref[...]                                  # compute_dtype
    theta = theta_ref[...]                          # compute_dtype
    x = x_ref[0]                                    # [N, F_in0]

    y = x
    for meta in layer_meta:
        (_K, T, f_out, f_in, kf, activation,
         r_w0, r_vb, r_wd, r_mavg) = meta

        w0 = theta[r_w0:r_w0 + f_in, :kf]           # [F_in, K*F_out]
        v = theta[r_vb:r_vb + f_in, :kf]            # [F_in, K*F_out]
        brow = theta[r_vb + f_in:r_vb + f_in + 1, :kf]   # [1, K*F_out] bias

        # Root term (t-invariant under shared_weights), hoisted out of T loop.
        root = jnp.dot(x, v, preferred_element_type=f32) + brow

        # t == 0:  A @ (x @ W0) == (A @ x) @ W0 -> single [N,N] propagation.
        px = jnp.dot(A, x, preferred_element_type=f32)
        out = jnp.dot(px.astype(compute_dtype), w0,
                      preferred_element_type=f32) + root
        out = jnp.maximum(out, 0.0)                 # ARMAConv internal ReLU

        if T > 1:
            wd = theta[r_wd:r_wd + kf, :kf]         # block-diagonal [kf, kf]
            for _ in range(1, T):                   # T is small & static
                out = jnp.dot(out.astype(compute_dtype), wd,
                              preferred_element_type=f32)
                out = jnp.dot(A, out.astype(compute_dtype),
                              preferred_element_type=f32)
                out = jnp.maximum(out + root, 0.0)

        # Mean over stacks as one matmul (lane-dense, no lane slices).
        mavg = theta[r_mavg:r_mavg + kf, :f_out]    # [kf, F_out], entries 1/K
        y = jnp.dot(out.astype(compute_dtype), mavg,
                    preferred_element_type=f32)

        if activation == 'relu':                    # module-level activation
            y = jnp.maximum(y, 0.0)
        x = y.astype(compute_dtype)                 # input to the next layer

    if final_linear:                                # nn.Linear(1, 1)
        lin = theta[lin_row:lin_row + 1, 0:2]       # [1, 2] = [w, b]
        y = y * lin[:, 0:1] + lin[:, 1:2]
    if final_sigmoid:                               # nn.Sigmoid()
        y = jax.nn.sigmoid(y)

    o_ref[0] = y.astype(o_ref.dtype)


def _estimate_cost(n_graphs, n, layer_meta, f_last, final_linear,
                   final_sigmoid, input_arrays):
    flops = 0
    for (_K, T, f_out, f_in, kf, *_rest) in layer_meta:
        flops += 2 * n * f_in * kf                  # root = x @ V
        flops += 2 * n * n * f_in                   # A @ x
        flops += 2 * n * f_in * kf                  # (A@x) @ W0
        flops += (T - 1) * (2 * n * kf * kf + 2 * n * n * kf)
        flops += 2 * n * kf * f_out                 # stack-mean matmul
    flops *= n_graphs
    if final_linear:
        flops += 2 * n_graphs * n * f_last
    transc = n_graphs * n * f_last if final_sigmoid else 0
    nbytes = sum(int(a.size) * a.dtype.itemsize for a in input_arrays)
    nbytes += n_graphs * n * f_last * 4
    return int(flops), int(transc), int(nbytes)


def arma_net_forward_fused(A, x_batch, packed,
                           final_linear_layer=True, final_sigmoid_layer=True):
    """Single batched pallas_call running the whole ArmaNet_ray forward."""
    theta = packed['theta']
    layer_meta = packed['layer_meta']
    compute_dtype = theta.dtype
    n_graphs, n, f_in0 = x_batch.shape
    f_last = layer_meta[-1][2]

    A_c = A.astype(compute_dtype)
    x_c = x_batch.astype(compute_dtype)

    kernel = functools.partial(
        _fused_forward_kernel,
        layer_meta=layer_meta,
        lin_row=packed['lin_row'],
        final_linear=final_linear_layer,
        final_sigmoid=final_sigmoid_layer,
        compute_dtype=compute_dtype,
    )
    flops, transc, nbytes = _estimate_cost(
        n_graphs, n, layer_meta, f_last, final_linear_layer,
        final_sigmoid_layer, (A_c, x_c, theta))

    return pl.pallas_call(
        kernel,
        out_shape=jax.ShapeDtypeStruct((n_graphs, n, f_last), jnp.float32),
        grid=(n_graphs,),
        in_specs=[
            pl.BlockSpec((n, n), lambda b: (0, 0)),            # A: shared
            pl.BlockSpec((1, n, f_in0), lambda b: (b, 0, 0)),  # x: per graph
            pl.BlockSpec(theta.shape, lambda b: (0, 0)),       # theta: shared
        ],
        out_specs=pl.BlockSpec((1, n, f_last), lambda b: (b, 0, 0)),
        compiler_params=pltpu.CompilerParams(
            dimension_semantics=("parallel",)),
        cost_estimate=pl.CostEstimate(flops=flops, transcendentals=transc,
                                      bytes_accessed=nbytes),
    )(A_c, x_c, theta)


# ----------------------------------------------------------------------------
# Parameter packing (host-side JAX glue, outside the kernel)
# ----------------------------------------------------------------------------
def _pad_to(a, rows, cols):
    return jnp.pad(a, ((0, rows - a.shape[0]), (0, cols - a.shape[1])))


def pack_model(conv_params, conv_configs, lin_w, lin_b, final_linear_layer,
               compute_dtype=jnp.bfloat16):
    """Pack all layers' ARMA weights + Linear(1,1) scalars into one slab."""
    kfs = [cfg['num_stacks'] * p['init_weight'].shape[2]
           for p, cfg in zip(conv_params, conv_configs)]
    cmax = max(kfs + [2])                           # >= 2 so the lin row fits

    sections, layer_meta = [], []
    row = 0

    def add(a):
        nonlocal row
        r0 = row
        rows = -(-a.shape[0] // 8) * 8              # sublane-align the section
        sections.append(_pad_to(a, rows, cmax))
        row += rows
        return r0

    for p, cfg in zip(conv_params, conv_configs):
        assert cfg['shared_weights'], "packed layout assumes shared_weights"
        iw = p['init_weight']                       # [K, F_in, F_out]
        K, f_in, f_out = iw.shape
        kf = K * f_out
        # stack k occupies columns [k*F_out, (k+1)*F_out)
        w0 = jnp.transpose(iw, (1, 0, 2)).reshape(f_in, kf)
        v = jnp.transpose(p['root_weight'][0], (1, 0, 2)).reshape(f_in, kf)
        b = p['bias'][0].reshape(1, kf)
        vb = jnp.concatenate([v, b], axis=0)        # [F_in + 1, kf]
        wt = p['weight'][0]                         # [K, F_out, F_out]
        wd = jnp.zeros((kf, kf), jnp.float32)       # block-diagonal pack
        for k in range(K):
            wd = wd.at[k * f_out:(k + 1) * f_out,
                       k * f_out:(k + 1) * f_out].set(wt[k])
        mavg = jnp.concatenate([jnp.eye(f_out, dtype=jnp.float32)] * K,
                               axis=0) / K          # [kf, F_out]
        layer_meta.append((K, cfg['num_layers'], f_out, f_in, kf,
                           cfg['activation'],
                           add(w0), add(vb), add(wd), add(mavg)))

    lin_row = -1
    if final_linear_layer:
        lin = jnp.zeros((1, cmax), jnp.float32)
        lin = lin.at[0, 0].set(lin_w.reshape(())).at[0, 1].set(lin_b.reshape(()))
        lin_row = add(lin)

    theta = jnp.concatenate(sections, axis=0).astype(compute_dtype)
    return dict(theta=theta, layer_meta=tuple(layer_meta), lin_row=lin_row)


def glorot(key, shape):
    fan_in, fan_out = shape[-2], shape[-1]
    limit = (6.0 / (fan_in + fan_out)) ** 0.5
    return jax.random.uniform(key, shape, jnp.float32, -limit, limit)


def init_arma_params(key, f_in, f_out, num_stacks, num_layers, shared_weights):
    k0, k1, k2, k3 = jax.random.split(key, 4)
    n_w = 1 if shared_weights else max(num_layers - 1, 1)
    n_r = 1 if shared_weights else num_layers
    return {
        'init_weight': glorot(k0, (num_stacks, f_in, f_out)),
        'weight':      glorot(k1, (n_w, num_stacks, f_out, f_out)),
        'root_weight': glorot(k2, (n_r, num_stacks, f_in, f_out)),
        'bias':        0.1 * jax.random.normal(k3, (n_r, num_stacks, 1, f_out),
                                               jnp.float32),
    }


def gcn_norm_dense(src, dst, edge_weight, n):
    """PyG gcn_norm(add_self_loops=False) densified: A_hat[dst, src] = norm."""
    deg = jnp.zeros((n,), jnp.float32).at[dst].add(edge_weight)
    dinv = jnp.where(deg > 0, jax.lax.rsqrt(deg), 0.0)
    norm = dinv[src] * edge_weight * dinv[dst]
    return jnp.zeros((n, n), jnp.float32).at[dst, src].add(norm)


# ----------------------------------------------------------------------------
# Pure-JAX reference (original per-stack / per-t ordering) for validation
# ----------------------------------------------------------------------------
def arma_net_reference(A, x, conv_params, conv_configs, lin_w, lin_b,
                       final_linear_layer, final_sigmoid_layer):
    hp = jax.lax.Precision.HIGHEST
    for p, cfg in zip(conv_params, conv_configs):
        K, T = cfg['num_stacks'], cfg['num_layers']
        shared = cfg['shared_weights']
        x0 = x
        outs = []
        for k in range(K):
            out = x0
            for t in range(T):
                w = (p['init_weight'][k] if t == 0 else
                     (p['weight'][0, k] if shared else p['weight'][t - 1, k]))
                out = jnp.dot(out, w, precision=hp)
                out = jnp.dot(A, out, precision=hp)
                vi = 0 if shared else t
                out = out + jnp.dot(x0, p['root_weight'][vi, k], precision=hp)
                out = out + p['bias'][vi, k]
                out = jax.nn.relu(out)
            outs.append(out)
        x = sum(outs) / K
        if cfg['activation'] == 'relu':
            x = jax.nn.relu(x)
    if final_linear_layer:
        x = jnp.dot(x, lin_w, precision=hp) + lin_b
    if final_sigmoid_layer:
        x = jax.nn.sigmoid(x)
    return x


# ----------------------------------------------------------------------------
if __name__ == "__main__":
    key = jax.random.PRNGKey(0)
    k_x, k_w, k_g, k_lin = jax.random.split(key, 4)

    # --- model configuration (ArmaNet_ray __init__ args) ---
    B = 8                                    # graphs per fused call (grid axis)
    N = 32                                   # nodes per graph
    num_layers = 2
    num_channels = [4, 8, 1]
    activations = ['relu', None]
    num_internal_layers = [2, 2]
    num_internal_stacks = [2, 2]
    batch_norm_index = [False, False]        # BN disabled
    shared_weights = True
    final_linear_layer = True
    final_sigmoid_layer = True

    # --- data.x : a batch of B graphs sharing one topology ---
    x = jax.random.normal(k_x, (B, N, num_channels[0]), jnp.float32)

    # --- data.edge_index / data.edge_attr: ring + skip-5 graph, both dirs ---
    idx = jnp.arange(N)
    src = jnp.concatenate([idx, (idx + 1) % N, idx, (idx + 5) % N])
    dst = jnp.concatenate([(idx + 1) % N, idx, (idx + 5) % N, idx])
    edge_weight = jax.random.uniform(k_g, (src.shape[0],), jnp.float32, 0.5, 1.5)
    A_hat = gcn_norm_dense(src, dst, edge_weight, N)

    # --- parameters (deterministic) ---
    conv_params, conv_configs = [], []
    layer_keys = jax.random.split(k_w, num_layers)
    for i in range(num_layers):
        p = init_arma_params(layer_keys[i], num_channels[i], num_channels[i + 1],
                             num_internal_stacks[i], num_internal_layers[i],
                             shared_weights)
        conv_params.append(p)
        conv_configs.append(dict(activation=activations[i],
                                 num_layers=num_internal_layers[i],
                                 num_stacks=num_internal_stacks[i],
                                 shared_weights=shared_weights))

    kw, kb = jax.random.split(k_lin)
    lin_w = jax.random.uniform(kw, (1, 1), jnp.float32, -1.0, 1.0)
    lin_b = jax.random.uniform(kb, (1, 1), jnp.float32, -1.0, 1.0)

    # --- pure-JAX reference (original op ordering, HIGHEST precision) ---
    ref = jnp.stack([
        arma_net_reference(A_hat, x[i], conv_params, conv_configs, lin_w, lin_b,
                           final_linear_layer, final_sigmoid_layer)
        for i in range(B)])
    ref = jax.block_until_ready(ref)

    # --- f32 packing: tight correctness check of the fused/packed kernel ---
    packed_f32 = pack_model(conv_params, conv_configs, lin_w, lin_b,
                            final_linear_layer, compute_dtype=jnp.float32)
    out_f32 = arma_net_forward_fused(A_hat, x, packed_f32,
                                     final_linear_layer, final_sigmoid_layer)
    out_f32 = jax.block_until_ready(out_f32)
    assert out_f32.shape == (B, N, 1)
    err_f32 = float(jnp.max(jnp.abs(out_f32 - ref)))
    assert err_f32 < 1e-2, f"f32 kernel mismatch vs reference: {err_f32}"

    # --- bf16 packing: performance configuration (bf16 MXU operands) ---
    packed_bf16 = pack_model(conv_params, conv_configs, lin_w, lin_b,
                             final_linear_layer, compute_dtype=jnp.bfloat16)
    out_bf16 = arma_net_forward_fused(A_hat, x, packed_bf16,
                                      final_linear_layer, final_sigmoid_layer)
    out_bf16 = jax.block_until_ready(out_bf16)
    assert out_bf16.shape == (B, N, 1)
    # looser tolerance: bf16 operands vs HIGHEST-precision f32 reference
    err_bf16 = float(jnp.max(jnp.abs(out_bf16 - ref)))
    assert err_bf16 < 7.5e-2, f"bf16 kernel mismatch vs reference: {err_bf16}"

    print("KERNEL_OK")
</pallas_src>

<mosaic_0001>
module attributes {stable_mosaic.version = 11 : i64} {
  func.func @_fused_forward_kernel(%arg0: i32, %arg1: memref<32x32xf32, #tpu.memory_space<vmem>>, %arg2: memref<1x32x4xf32, #tpu.memory_space<vmem>>, %arg3: memref<96x16xf32, #tpu.memory_space<vmem>>, %arg4: memref<1x32x1xf32, #tpu.memory_space<vmem>>) attributes {dimension_semantics = [#tpu.dimension_semantics<parallel>], iteration_bounds = array<i64: 8>, scalar_prefetch = 0 : i64, scratch_operands = 0 : i64, tpu.core_type = #tpu.core_type<tc>, window_params = [{pipeline_mode = #tpu.pipeline_mode<synchronous>, transform_indices = @transform_0, window_bounds = array<i64: 32, 32>}, {transform_indices = @transform_1, window_bounds = array<i64: 1, 32, 4>}, {pipeline_mode = #tpu.pipeline_mode<synchronous>, transform_indices = @transform_2, window_bounds = array<i64: 96, 16>}, {transform_indices = @transform_3, window_bounds = array<i64: 1, 32, 1>}]} {
    %c0 = arith.constant 0 : index
    %c0_0 = arith.constant 0 : index
    %0 = vector.load %arg1[%c0, %c0_0] : memref<32x32xf32, #tpu.memory_space<vmem>>, vector<32x32xf32>
    %c0_1 = arith.constant 0 : index
    %c0_2 = arith.constant 0 : index
    %1 = vector.load %arg3[%c0_1, %c0_2] : memref<96x16xf32, #tpu.memory_space<vmem>>, vector<96x16xf32>
    %c0_3 = arith.constant 0 : index
    %c0_4 = arith.constant 0 : index
    %c0_5 = arith.constant 0 : index
    %2 = vector.load %arg2[%c0_3, %c0_4, %c0_5] : memref<1x32x4xf32, #tpu.memory_space<vmem>>, vector<1x32x4xf32>
    %3 = vector.shape_cast %2 : vector<1x32x4xf32> to vector<32x4xf32>
    %4 = vector.extract_strided_slice %1 {offsets = [0, 0], sizes = [4, 16], strides = [1, 1]} : vector<96x16xf32> to vector<4x16xf32>
    %5 = vector.extract_strided_slice %1 {offsets = [8, 0], sizes = [4, 16], strides = [1, 1]} : vector<96x16xf32> to vector<4x16xf32>
    %6 = vector.extract_strided_slice %1 {offsets = [12, 0], sizes = [1, 16], strides = [1, 1]} : vector<96x16xf32> to vector<1x16xf32>
    %cst = arith.constant dense<0.000000e+00> : vector<32x16xf32>
    %7 = tpu.matmul %3, %5, %cst {dimension_numbers = #tpu.dot_dimension_numbers<[1], [0], [0], [1], [0, 0, 1, 1], [], []>} : vector<32x4xf32>, vector<4x16xf32>, vector<32x16xf32> -> vector<32x16xf32>
    %8 = vector.broadcast %6 : vector<1x16xf32> to vector<32x16xf32>
    %9 = arith.addf %7, %8 : vector<32x16xf32>
    %cst_6 = arith.constant dense<0.000000e+00> : vector<32x4xf32>
    %10 = tpu.matmul %0, %3, %cst_6 {dimension_numbers = #tpu.dot_dimension_numbers<[1], [0], [0], [1], [0, 0, 1, 1], [], []>} : vector<32x32xf32>, vector<32x4xf32>, vector<32x4xf32> -> vector<32x4xf32>
    %cst_7 = arith.constant dense<0.000000e+00> : vector<32x16xf32>
    %11 = tpu.matmul %10, %4, %cst_7 {dimension_numbers = #tpu.dot_dimension_numbers<[1], [0], [0], [1], [0, 0, 1, 1], [], []>} : vector<32x4xf32>, vector<4x16xf32>, vector<32x16xf32> -> vector<32x16xf32>
    %12 = arith.addf %11, %9 : vector<32x16xf32>
    %cst_8 = arith.constant 0.000000e+00 : f32
    %13 = vector.broadcast %cst_8 : f32 to vector<32x16xf32>
    %14 = arith.maximumf %12, %13 : vector<32x16xf32>
    %15 = vector.extract_strided_slice %1 {offsets = [16, 0], sizes = [16, 16], strides = [1, 1]} : vector<96x16xf32> to vector<16x16xf32>
    %cst_9 = arith.constant dense<0.000000e+00> : vector<32x16xf32>
    %16 = tpu.matmul %14, %15, %cst_9 {dimension_numbers = #tpu.dot_dimension_numbers<[1], [0], [0], [1], [0, 0, 1, 1], [], []>} : vector<32x16xf32>, vector<16x16xf32>, vector<32x16xf32> -> vector<32x16xf32>
    %cst_10 = arith.constant dense<0.000000e+00> : vector<32x16xf32>
    %17 = tpu.matmul %0, %16, %cst_10 {dimension_numbers = #tpu.dot_dimension_numbers<[1], [0], [0], [1], [0, 0, 1, 1], [], []>} : vector<32x32xf32>, vector<32x16xf32>, vector<32x16xf32> -> vector<32x16xf32>
    %18 = arith.addf %17, %9 : vector<32x16xf32>
    %cst_11 = arith.constant 0.000000e+00 : f32
    %19 = vector.broadcast %cst_11 : f32 to vector<32x16xf32>
    %20 = arith.maximumf %18, %19 : vector<32x16xf32>
    %21 = vector.extract_strided_slice %1 {offsets = [32, 0], sizes = [16, 8], strides = [1, 1]} : vector<96x16xf32> to vector<16x8xf32>
    %cst_12 = arith.constant dense<0.000000e+00> : vector<32x8xf32>
    %22 = tpu.matmul %20, %21, %cst_12 {dimension_numbers = #tpu.dot_dimension_numbers<[1], [0], [0], [1], [0, 0, 1, 1], [], []>} : vector<32x16xf32>, vector<16x8xf32>, vector<32x8xf32> -> vector<32x8xf32>
    %cst_13 = arith.constant 0.000000e+00 : f32
    %23 = vector.broadcast %cst_13 : f32 to vector<32x8xf32>
    %24 = arith.maximumf %22, %23 : vector<32x8xf32>
    %25 = vector.extract_strided_slice %1 {offsets = [48, 0], sizes = [8, 2], strides = [1, 1]} : vector<96x16xf32> to vector<8x2xf32>
    %26 = vector.extract_strided_slice %1 {offsets = [56, 0], sizes = [8, 2], strides = [1, 1]} : vector<96x16xf32> to vector<8x2xf32>
    %27 = vector.extract_strided_slice %1 {offsets = [64, 0], sizes = [1, 2], strides = [1, 1]} : vector<96x16xf32> to vector<1x2xf32>
    %cst_14 = arith.constant dense<0.000000e+00> : vector<32x2xf32>
    %28 = tpu.matmul %24, %26, %cst_14 {dimension_numbers = #tpu.dot_dimension_numbers<[1], [0], [0], [1], [0, 0, 1, 1], [], []>} : vector<32x8xf32>, vector<8x2xf32>, vector<32x2xf32> -> vector<32x2xf32>
    %29 = vector.broadcast %27 : vector<1x2xf32> to vector<32x2xf32>
    %30 = arith.addf %28, %29 : vector<32x2xf32>
    %cst_15 = arith.constant dense<0.000000e+00> : vector<32x8xf32>
    %31 = tpu.matmul %0, %24, %cst_15 {dimension_numbers = #tpu.dot_dimension_numbers<[1], [0], [0], [1], [0, 0, 1, 1], [], []>} : vector<32x32xf32>, vector<32x8xf32>, vector<32x8xf32> -> vector<32x8xf32>
    %cst_16 = arith.constant dense<0.000000e+00> : vector<32x2xf32>
    %32 = tpu.matmul %31, %25, %cst_16 {dimension_numbers = #tpu.dot_dimension_numbers<[1], [0], [0], [1], [0, 0, 1, 1], [], []>} : vector<32x8xf32>, vector<8x2xf32>, vector<32x2xf32> -> vector<32x2xf32>
    %33 = arith.addf %32, %30 : vector<32x2xf32>
    %cst_17 = arith.constant 0.000000e+00 : f32
    %34 = vector.broadcast %cst_17 : f32 to vector<32x2xf32>
    %35 = arith.maximumf %33, %34 : vector<32x2xf32>
    %36 = vector.extract_strided_slice %1 {offsets = [72, 0], sizes = [2, 2], strides = [1, 1]} : vector<96x16xf32> to vector<2x2xf32>
    %cst_18 = arith.constant dense<0.000000e+00> : vector<32x2xf32>
    %37 = tpu.matmul %35, %36, %cst_18 {dimension_numbers = #tpu.dot_dimension_numbers<[1], [0], [0], [1], [0, 0, 1, 1], [], []>} : vector<32x2xf32>, vector<2x2xf32>, vector<32x2xf32> -> vector<32x2xf32>
    %cst_19 = arith.constant dense<0.000000e+00> : vector<32x2xf32>
    %38 = tpu.matmul %0, %37, %cst_19 {dimension_numbers = #tpu.dot_dimension_numbers<[1], [0], [0], [1], [0, 0, 1, 1], [], []>} : vector<32x32xf32>, vector<32x2xf32>, vector<32x2xf32> -> vector<32x2xf32>
    %39 = arith.addf %38, %30 : vector<32x2xf32>
    %cst_20 = arith.constant 0.000000e+00 : f32
    %40 = vector.broadcast %cst_20 : f32 to vector<32x2xf32>
    %41 = arith.maximumf %39, %40 : vector<32x2xf32>
    %42 = vector.extract_strided_slice %1 {offsets = [80, 0], sizes = [2, 1], strides = [1, 1]} : vector<96x16xf32> to vector<2x1xf32>
    %cst_21 = arith.constant dense<0.000000e+00> : vector<32x1xf32>
    %43 = tpu.matmul %41, %42, %cst_21 {dimension_numbers = #tpu.dot_dimension_numbers<[1], [0], [0], [1], [0, 0, 1, 1], [], []>} : vector<32x2xf32>, vector<2x1xf32>, vector<32x1xf32> -> vector<32x1xf32>
    %44 = vector.extract_strided_slice %1 {offsets = [88, 0], sizes = [1, 2], strides = [1, 1]} : vector<96x16xf32> to vector<1x2xf32>
    %45 = vector.extract_strided_slice %44 {offsets = [0, 0], sizes = [1, 1], strides = [1, 1]} : vector<1x2xf32> to vector<1x1xf32>
    %46 = vector.broadcast %45 : vector<1x1xf32> to vector<32x1xf32>
    %47 = arith.mulf %43, %46 : vector<32x1xf32>
    %48 = vector.extract_strided_slice %44 {offsets = [0, 1], sizes = [1, 1], strides = [1, 1]} : vector<1x2xf32> to vector<1x1xf32>
    %49 = vector.broadcast %48 : vector<1x1xf32> to vector<32x1xf32>
    %50 = arith.addf %47, %49 : vector<32x1xf32>
    %51 = arith.negf %50 : vector<32x1xf32>
    %52 = math.exp %51 : vector<32x1xf32>
    %cst_22 = arith.constant 1.000000e+00 : f32
    %53 = vector.broadcast %cst_22 : f32 to vector<32x1xf32>
    %54 = arith.addf %53, %52 : vector<32x1xf32>
    %55 = arith.divf %53, %54 : vector<32x1xf32>
    %c0_23 = arith.constant 0 : index
    %c0_24 = arith.constant 0 : index
    %c0_25 = arith.constant 0 : index
    %56 = vector.load %arg4[%c0_23, %c0_24, %c0_25] : memref<1x32x1xf32, #tpu.memory_space<vmem>>, vector<1x32x1xf32>
    %57 = vector.shape_cast %56 : vector<1x32x1xf32> to vector<32x1xf32>
    %58 = vector.shape_cast %55 : vector<32x1xf32> to vector<1x32x1xf32>
    tpu.vector_store %arg4[%c0_23, %c0_24, %c0_25], %58 {strides = array<i32>} : memref<1x32x1xf32, #tpu.memory_space<vmem>>, vector<1x32x1xf32>,
    return
  }
  func.func @transform_0(%arg0: i32) -> (i32, i32) {
    %c0_i32 = arith.constant 0 : i32
    %c0_i32_0 = arith.constant 0 : i32
    %c0_i32_1 = arith.constant 0 : i32
    return %c0_i32, %c0_i32_0 : i32, i32
  }
  func.func @transform_1(%arg0: i32) -> (i32, i32, i32) {
    %c0_i32 = arith.constant 0 : i32
    %c0_i32_0 = arith.constant 0 : i32
    %c0_i32_1 = arith.constant 0 : i32
    return %arg0, %c0_i32, %c0_i32_0 : i32, i32, i32
  }
  func.func @transform_2(%arg0: i32) -> (i32, i32) {
    %c0_i32 = arith.constant 0 : i32
    %c0_i32_0 = arith.constant 0 : i32
    %c0_i32_1 = arith.constant 0 : i32
    return %c0_i32, %c0_i32_0 : i32, i32
  }
  func.func @transform_3(%arg0: i32) -> (i32, i32, i32) {
    %c0_i32 = arith.constant 0 : i32
    %c0_i32_0 = arith.constant 0 : i32
    %c0_i32_1 = arith.constant 0 : i32
    return %arg0, %c0_i32, %c0_i32_0 : i32, i32, i32
  }
}

</mosaic_0001>

<bundles_post_ra>
// kernel: tpu_custom_call.1
= control target key start
LH: loop header
LB: loop body
LE: loop exit
PB: predicated region body
PF: predicated region fallthrough
CT: control target
= control target key end

     0   :  { %s1795_s12 = smov 0   ;;  %s1959_s0 = inlined_call_operand.vmem [shape: f32[32,32], index: 0, kind: input, shape index: {}]   ;;  %s1960_s1 = inlined_call_operand.vmem [shape: f32[8,32,4], index: 1, kind: input, shape index: {}]   ;;  %s1961_s2 = inlined_call_operand.vmem [shape: f32[96,16], index: 2, kind: input, shape index: {}]   ;;  %s1962_s3 = inlined_call_operand.vmem [shape: f32[8,32,1], index: 3, kind: output, shape index: {}]  }
   0x1 LB: > { %s1466_s13 = sadd.s32 4294967295, %s1772_s12   ;;  %p1470_p0 = scmp.ge.s32.totalorder %s1772_s12, 1  ;;  %s1772_s12 = sphi %s1795_s12, %s13_s12  }
   0x2   : > { %p137_p1 = scmp.lt.s32.totalorder %s1772_s12, 9 }
   0x4   : > { %p138_p2 = pnand %p1470_p0, %p137_p1 }
   0x5   : > { %p161_p3 = scmp.lt.s32.totalorder (!%p138_p2), %s1466_s13, 7  ;;  %s1774_s26 = smov (!%p138_p2), 127  }
   0x6   : > { %141 = sbr.rel (%p138_p2) target bundleno = 2070 (0x816), region = 32 }
   0xb   : > { %v176_v0 = vld [vmem:[%s1961_s2 + $0x8] sm:$0xff]  ;;  %vm208_vm0 = vcmask 1043456   ;;  %vm297_vm1 = vcmask 261120   ;;  %v1810_v1 = vld [vmem:[%s1959_s0 + $0x10] sm:$0xff]  ;;  %s1964_s13 = smov (!%p161_p3, %s1466_s13), 7  ;;  %vm195_vm2 = vcmask 31744   ;;  %v191_v10 = vlaneseq }
   0xc   : > { %1609 = vmatprep.subr.msk.mxu0 %vm208_vm0, %v176_v0  ;;  %1628 = vmatprep.mubr.msk.f32.mxu1 %vm297_vm1, %v1810_v1  ;;  %s1533_s18 = sshll.u32 %s1964_s13, 5  ;;  %v1830_v6 = vld [vmem:[%s1959_s0] sm:$0xff]  ;;  %v1835_v7 = vld [vmem:[%s1959_s0 + $0x8] sm:$0xff]  ;;  %v1840_v8 = vld [vmem:[%s1959_s0 + $0x18] sm:$0xff]  ;;  %vm499_vm3 = vcmask 130048   ;;  %vm791_vm4 = vcmask 64512  }
   0xd   : > { %1610 = vmatpush3.msk.msra.mxu0 %vm208_vm0, %v176_v0  ;;  %s165_s21 = scalar_lea.vmem %s1960_s1, %s1533_s18  ;;  %v175_v9 = vld [vmem:[%s1961_s2] sm:$0xff]  ;;  %v1853_v11 = vshrl.u32 %v191_v10, 7  ;;  %v178_v26 = vld [vmem:[%s1961_s2 + $0x18] sm:$0xff]  ;;  %v177_v27 = vld [vmem:[%s1961_s2 + $0x10] sm:$0xff]  ;;  %vm1088_vm5 = vcmask 1041408   ;;  %vm1075_vm6 = vcmask 15360   ;;  %s170_s29 = scalar_lea.vmem %s1962_s3, %s1533_s18 }
   0xe   : > { %v187_v2 = vld [vmem:[%s165_s21] sm:$0xff]  ;;  %v188_v3 = vld [vmem:[%s165_s21 + $0x8] sm:$0xff]  ;;  %v190_v4 = vld [vmem:[%s165_s21 + $0x18] sm:$0xff]  ;;  %vm1406_vm7 = vcmask 7168  }
   0xf   : > { %1611 = vmatprep.mubr.msk.f32.mxu0 %vm195_vm2, %v187_v2  ;;  %1617 = vmatprep.subr.mxu0 %v190_v4  ;;  %v189_v5 = vld [vmem:[%s165_s21 + $0x10] sm:$0xff]  ;;  %v193_v12 = vsub.s32 4, %v1853_v11  ;;  %v180_v44 = vld [vmem:[%s1961_s2 + $0x28] sm:$0xff]  ;;  %v179_v45 = vld [vmem:[%s1961_s2 + $0x20] sm:$0xff] }
  0x10   : > { %1612 = vmatmul.mubr.msk.f32.vlgmr.msra.gmra.mxu0 %vm195_vm2, %v188_v3  ;;  %1733 = vmatprep.subr.mxu1 %v190_v4  ;;  %v182_v58 = vld [vmem:[%s1961_s2 + $0x38] sm:$0xff] }
  0x11   : > { %1618 = vmatpush3.msra.mxu0 %v190_v4  ;;  %1614 = vmatprep.mubr.msk.f32.mxu0 %vm195_vm2, %v189_v5  ;;  %v194_v13 = vrot.slane %v176_v0, %v193_v12 }
  0x12   : > { %1619 = vmatprep.subr.mxu0 %v189_v5  ;;  %1737 = vmatpush3.msra.mxu1 %v190_v4 }
  0x13   : > { %1620 = vmatpush3.msra.mxu0 %v189_v5  ;;  %1734 = vmatprep.subr.mxu1 %v189_v5 }
  0x14   : > { %1615 = vmatmul.mubr.msk.f32.gmra.mxu0 %vm195_vm2, %v190_v4  ;;  %1621 = vmatprep.subr.mxu0 %v188_v3  ;;  %v181_v4 = vld [vmem:[%s1961_s2 + $0x30] sm:$0xff] }
  0x15   : > { %1738 = vmatpush3.msra.mxu1 %v189_v5  ;;  %1622 = vmatpush3.msra.mxu0 %v188_v3 }
  0x16   : > { %1735 = vmatprep.subr.mxu1 %v188_v3  ;;  %1623 = vmatprep.subr.mxu0 %v187_v2 }
  0x17   : > { %1739 = vmatpush3.msra.mxu1 %v188_v3  ;;  %1624 = vmatpush3.msra.mxu0 %v187_v2 }
  0x18   : > { %1625 = vmatprep.mubr.msk.f32.mxu0 %vm297_vm1, %v1830_v6  ;;  %1736 = vmatprep.subr.mxu1 %v187_v2 }
  0x19   : > { %1626 = vmatmul.mubr.msk.f32.vlgmr.msra.gmra.mxu0 %vm297_vm1, %v1835_v7  ;;  %1740 = vmatpush3.msra.mxu1 %v187_v2 }
  0x1a   : > { %1629 = vmatmul.mubr.msk.f32.vlgmr.msra.gmra.mxu1 %vm297_vm1, %v1840_v8  ;;  %1631 = vmatprep.subr.msk.mxu0 %vm208_vm0, %v175_v9 }
  0x1b   : > { %1632 = vmatpush3.msk.msra.mxu0 %vm208_vm0, %v175_v9  ;;  %1639 = vmatprep.subr.mxu1 %v178_v26 }
  0x1c   : > { %1640 = vmatpush3.msra.mxu1 %v178_v26 }
  0x1d   : > { %1641 = vmatprep.subr.mxu1 %v177_v27 }
  0x1e   : > { %1642 = vmatpush3.msra.mxu1 %v177_v27 }
  0x1f   : > { %1663 = vmatprep.subr.mxu1 %v180_v44 }
  0xd0   : > { %v1613_v14 = vpop.f32.mrf.mxu0 }
  0xd1   : > { %v284_v15 = vadd.f32 %v1613_v14, %v194_v13 }
  0xd2   : > { %v278_v16 = vpop.f32.mrf.mxu0 }
  0xd3   : > { %v279_v17 = vadd.f32 %v278_v16, %v194_v13  ;;  %v789_v16 = vsub.s32 0, %v1853_v11 }
  0xd4   : > { %v1616_v18 = vpop.f32.mrf.mxu0 }
  0xd5   : > { %v1856_v19 = vadd.f32 %v1616_v18, %v194_v13 }
  0xd6   : > { %v288_v20 = vpop.f32.mrf.mxu0 }
  0xd7   : > { %v1858_v21 = vadd.f32 %v288_v20, %v194_v13  ;;  %v184_v13 = vld [vmem:[%s1961_s2 + $0x48] sm:$0xff] }
  0xd9   : > { %v1627_v22 = vpop.f32.mrf.mxu0 }
  0xda   : > { %v1630_v23 = vpop.f32.mrf.mxu1 }
  0xdb   : > { %v376_v24 = vpop.f32.mrf.mxu0 }
  0xdc   : > { %1633 = vmatprep.mubr.msk.f32.mxu0 %vm195_vm2, %v376_v24  ;;  %v386_v25 = vpop.f32.mrf.mxu1 }
  0xdd   : > { %1634 = vmatmul.mubr.msk.f32.vlgmr.msra.gmra.mxu0 %vm195_vm2, %v1627_v22 }
  0xde   : > { %1636 = vmatprep.mubr.msk.f32.mxu0 %vm195_vm2, %v386_v25 }
  0xe1   : > { %1637 = vmatmul.mubr.msk.f32.gmra.mxu0 %vm195_vm2, %v1630_v23 }
  0xe2   : > { %1657 = vmatprep.mubr.msk.f32.mxu0 %vm297_vm1, %v1830_v6 }
 0x19d   : > { %v1635_v28 = vpop.f32.mrf.mxu0 }
 0x19e   : > { %v482_v29 = vadd.f32 %v1635_v28, %v284_v15 }
 0x19f   : > { %v476_v30 = vpop.f32.mrf.mxu0 }
 0x1a0   : > { %v477_v31 = vadd.f32 %v476_v30, %v279_v17  ;;  %v496_v34 = vmax.f32 %v482_v29, 0.0 }
 0x1a1   : > { %v1638_v32 = vpop.f32.mrf.mxu0 }
 0x1a2   : > { %v495_v33 = vmax.f32 %v477_v31, 0.0  ;;  %v492_v35 = vadd.f32 %v1638_v32, %v1856_v19 }
 0x1a3   : > { %v486_v36 = vpop.f32.mrf.mxu0 }
 0x1a4   : > { %v487_v37 = vadd.f32 %v486_v36, %v1858_v21  ;;  %1643 = vmatprep.mubr.msk.f32.mxu1 %vm499_vm3, %v495_v33  ;;  %v498_v39 = vmax.f32 %v492_v35, 0.0 }
 0x1a5   : > { %1644 = vmatmul.mubr.msk.f32.vlgmr.msra.gmra.mxu1 %vm499_vm3, %v496_v34 }
 0x1a6   : > { %v497_v38 = vmax.f32 %v487_v37, 0.0  ;;  %1664 = vmatpush3.msra.mxu1 %v180_v44 }
 0x1a7   : > { %1665 = vmatprep.subr.mxu1 %v179_v45 }
 0x1a8   : > { %1646 = vmatprep.mubr.msk.f32.mxu1 %vm499_vm3, %v497_v38  ;;  %1666 = vmatpush3.msra.mxu1 %v179_v45 }
 0x1a9   : > { %1647 = vmatmul.mubr.msk.f32.gmra.mxu1 %vm499_vm3, %v498_v39  ;;  %v185_v39 = vld [vmem:[%s1961_s2 + $0x50] sm:$0xff] }
 0x265   : > { %v1645_v40 = vpop.f32.mrf.mxu1 }
 0x267   : > { %v578_v41 = vpop.f32.mrf.mxu1 }
 0x269   : > { %v1648_v42 = vpop.f32.mrf.mxu1 }
 0x26a   : > { %1649 = vmatprep.subr.mxu0 %v1648_v42 }
 0x26b   : > { %v588_v43 = vpop.f32.mrf.mxu1  ;;  %1650 = vmatpush3.msra.mxu0 %v1648_v42 }
 0x26c   : > { %1651 = vmatprep.subr.mxu0 %v588_v43 }
 0x26d   : > { %1652 = vmatpush3.msra.mxu0 %v588_v43 }
 0x26e   : > { %1653 = vmatprep.subr.mxu0 %v1645_v40 }
 0x26f   : > { %1654 = vmatpush3.msra.mxu0 %v1645_v40  ;;  %v186_v40 = vld [vmem:[%s1961_s2 + $0x58] sm:$0xff] }
 0x270   : > { %1655 = vmatprep.subr.mxu0 %v578_v41 }
 0x271   : > { %1656 = vmatpush3.msra.mxu0 %v578_v41  ;;  %v1369_v41 = vrot.slane %v186_v40, %v789_v16 }
 0x272   : > { %1658 = vmatmul.mubr.msk.f32.vlgmr.msra.gmra.mxu0 %vm297_vm1, %v1835_v7  ;;  %1673 = vmatprep.subr.mxu0 %v182_v58 }
 0x273   : > { %1660 = vmatprep.mubr.msk.f32.mxu0 %vm297_vm1, %v1810_v1  ;;  %1674 = vmatpush3.msra.mxu0 %v182_v58 }
 0x274   : > { %1695 = vmatprep.subr.mxu0 %v181_v4  ;;  %1375 = vrot.lane.b32.xlu0 %v1369_v41, %s1774_s26 }
 0x276   : > { %1661 = vmatmul.mubr.msk.f32.gmra.mxu0 %vm297_vm1, %v1840_v8 }
 0x332   : > { %v1659_v46 = vpop.f32.mrf.mxu0 }
 0x333   : > { %v669_v47 = vadd.f32 %v1659_v46, %v284_v15 }
 0x334   : > { %v663_v48 = vpop.f32.mrf.mxu0 }
 0x335   : > { %v664_v49 = vadd.f32 %v663_v48, %v279_v17  ;;  %v683_v52 = vmax.f32 %v669_v47, 0.0  ;;  %v183_v17 = vld [vmem:[%s1961_s2 + $0x40] sm:$0xff] }
 0x336   : > { %v1662_v50 = vpop.f32.mrf.mxu0 }
 0x337   : > { %v682_v51 = vmax.f32 %v664_v49, 0.0  ;;  %v679_v53 = vadd.f32 %v1662_v50, %v1856_v19  ;;  %v790_v19 = vrot.slane %v183_v17, %v789_v16 }
 0x338   : > { %v673_v54 = vpop.f32.mrf.mxu0 }
 0x339   : > { %v674_v55 = vadd.f32 %v673_v54, %v1858_v21  ;;  %1667 = vmatprep.mubr.msk.f32.mxu1 %vm499_vm3, %v682_v51  ;;  %v685_v57 = vmax.f32 %v679_v53, 0.0 }
 0x33a   : > { %1668 = vmatmul.mubr.msk.f32.vlgmr.msra.gmra.mxu1 %vm499_vm3, %v683_v52  ;;  %v1376_v52 = vpop.permute.xlu0 %1375 }
 0x33b   : > { %v684_v56 = vmax.f32 %v674_v55, 0.0 }
 0x33d   : > { %1670 = vmatprep.mubr.msk.f32.mxu1 %vm499_vm3, %v684_v56 }
 0x33e   : > { %1671 = vmatmul.mubr.msk.f32.gmra.mxu1 %vm499_vm3, %v685_v57 }
 0x33f   : > { %1689 = vmatprep.mubr.msk.f32.mxu1 %vm297_vm1, %v1830_v6 }
 0x3fa   : > { %v1669_v59 = vpop.f32.mrf.mxu1 }
 0x3fb   : > { %v784_v62 = vmax.f32 %v1669_v59, 0.0 }
 0x3fc   : > { %v764_v60 = vpop.f32.mrf.mxu1 }
 0x3fd   : > { %v783_v61 = vmax.f32 %v764_v60, 0.0 }
 0x3fe   : > { %v1672_v63 = vpop.f32.mrf.mxu1 }
 0x3ff   : > { %v786_v0 = vmax.f32 %v1672_v63, 0.0  ;;  %1675 = vmatprep.mubr.msk.f32.mxu0 %vm791_vm4, %v783_v61 }
 0x400   : > { %v774_v2 = vpop.f32.mrf.mxu1  ;;  %1676 = vmatmul.mubr.msk.f32.vlgmr.msra.gmra.mxu0 %vm791_vm4, %v784_v62 }
 0x401   : > { %v785_v3 = vmax.f32 %v774_v2, 0.0  ;;  %1681 = vmatprep.subr.mxu1 %v786_v0  ;;  %1696 = vmatpush3.msra.mxu0 %v181_v4 }
 0x402   : > { %1682 = vmatpush3.msra.mxu1 %v786_v0 }
 0x403   : > { %1678 = vmatprep.mubr.msk.f32.mxu0 %vm791_vm4, %v785_v3  ;;  %1683 = vmatprep.subr.mxu1 %v785_v3 }
 0x404   : > { %1679 = vmatmul.mubr.msk.f32.gmra.mxu0 %vm791_vm4, %v786_v0  ;;  %1684 = vmatpush3.msra.mxu1 %v785_v3 }
 0x405   : > { %1685 = vmatprep.subr.mxu1 %v784_v62 }
 0x406   : > { %1686 = vmatpush3.msra.mxu1 %v784_v62 }
 0x407   : > { %1687 = vmatprep.subr.mxu1 %v783_v61 }
 0x408   : > { %1688 = vmatpush3.msra.mxu1 %v783_v61 }
 0x409   : > { %1690 = vmatmul.mubr.msk.f32.vlgmr.msra.gmra.mxu1 %vm297_vm1, %v1835_v7  ;;  %1703 = vmatprep.subr.msk.mxu1 %vm1088_vm5, %v184_v13 }
 0x40a   : > { %1692 = vmatprep.mubr.msk.f32.mxu1 %vm297_vm1, %v1810_v1  ;;  %1704 = vmatpush3.msk.msra.mxu1 %vm1088_vm5, %v184_v13 }
 0x40b   : > { %1725 = vmatprep.subr.msk.mxu1 %vm1088_vm5, %v185_v39 }
 0x40d   : > { %1693 = vmatmul.mubr.msk.f32.gmra.mxu1 %vm297_vm1, %v1840_v8 }
 0x4c0   : > { %v1677_v14 = vpop.f32.mrf.mxu0 }
 0x4c1   : > { %v876_v20 = vadd.f32 %v1677_v14, %v790_v19 }
 0x4c2   : > { %v870_v15 = vpop.f32.mrf.mxu0 }
 0x4c3   : > { %v871_v22 = vadd.f32 %v870_v15, %v790_v19 }
 0x4c4   : > { %v1680_v18 = vpop.f32.mrf.mxu0 }
 0x4c5   : > { %v886_v26 = vadd.f32 %v1680_v18, %v790_v19 }
 0x4c9   : > { %v1691_v5 = vpop.f32.mrf.mxu1 }
 0x4cb   : > { %v955_v9 = vpop.f32.mrf.mxu1 }
 0x4cc   : > { %1697 = vmatprep.mubr.msk.f32.mxu0 %vm791_vm4, %v955_v9 }
 0x4cd   : > { %v1694_v10 = vpop.f32.mrf.mxu1  ;;  %1698 = vmatmul.mubr.msk.f32.vlgmr.msra.gmra.mxu0 %vm791_vm4, %v1691_v5 }
 0x4cf   : > { %v965_v12 = vpop.f32.mrf.mxu1 }
 0x4d0   : > { %1700 = vmatprep.mubr.msk.f32.mxu0 %vm791_vm4, %v965_v12 }
 0x4d1   : > { %1701 = vmatmul.mubr.msk.f32.gmra.mxu0 %vm791_vm4, %v1694_v10 }
 0x4d2   : > { %1719 = vmatprep.mubr.msk.f32.mxu0 %vm297_vm1, %v1830_v6  ;;  %v880_v6 = vpop.f32.mrf.mxu0 }
 0x4d3   : > { %v881_v28 = vadd.f32 %v880_v6, %v790_v19 }
 0x58d   : > { %v1699_v21 = vpop.f32.mrf.mxu0 }
 0x58e   : > { %v1058_v23 = vadd.f32 %v1699_v21, %v876_v20 }
 0x58f   : > { %v1052_v24 = vpop.f32.mrf.mxu0 }
 0x590   : > { %v1053_v25 = vadd.f32 %v1052_v24, %v871_v22  ;;  %v1072_v30 = vmax.f32 %v1058_v23, 0.0 }
 0x591   : > { %v1702_v27 = vpop.f32.mrf.mxu0 }
 0x592   : > { %v1071_v29 = vmax.f32 %v1053_v25, 0.0  ;;  %v1068_v11 = vadd.f32 %v1702_v27, %v886_v26 }
 0x593   : > { %v1062_v31 = vpop.f32.mrf.mxu0 }
 0x594   : > { %v1063_v32 = vadd.f32 %v1062_v31, %v881_v28  ;;  %1705 = vmatprep.mubr.msk.f32.mxu1 %vm1075_vm6, %v1071_v29  ;;  %v1074_v34 = vmax.f32 %v1068_v11, 0.0 }
 0x595   : > { %1706 = vmatmul.mubr.msk.f32.vlgmr.msra.gmra.mxu1 %vm1075_vm6, %v1072_v30 }
 0x596   : > { %v1073_v33 = vmax.f32 %v1063_v32, 0.0  ;;  %1726 = vmatpush3.msk.msra.mxu1 %vm1088_vm5, %v185_v39 }
 0x598   : > { %1708 = vmatprep.mubr.msk.f32.mxu1 %vm1075_vm6, %v1073_v33 }
 0x599   : > { %1709 = vmatmul.mubr.msk.f32.gmra.mxu1 %vm1075_vm6, %v1074_v34 }
 0x655   : > { %v1707_v35 = vpop.f32.mrf.mxu1 }
 0x657   : > { %v1158_v36 = vpop.f32.mrf.mxu1 }
 0x659   : > { %v1710_v37 = vpop.f32.mrf.mxu1 }
 0x65a   : > { %1711 = vmatprep.subr.mxu0 %v1710_v37 }
 0x65b   : > { %v1168_v38 = vpop.f32.mrf.mxu1  ;;  %1712 = vmatpush3.msra.mxu0 %v1710_v37 }
 0x65c   : > { %1713 = vmatprep.subr.mxu0 %v1168_v38 }
 0x65d   : > { %1714 = vmatpush3.msra.mxu0 %v1168_v38 }
 0x65e   : > { %1715 = vmatprep.subr.mxu0 %v1707_v35 }
 0x65f   : > { %1716 = vmatpush3.msra.mxu0 %v1707_v35 }
 0x660   : > { %1717 = vmatprep.subr.mxu0 %v1158_v36 }
 0x661   : > { %1718 = vmatpush3.msra.mxu0 %v1158_v36 }
 0x662   : > { %1720 = vmatmul.mubr.msk.f32.vlgmr.msra.gmra.mxu0 %vm297_vm1, %v1835_v7 }
 0x663   : > { %1722 = vmatprep.mubr.msk.f32.mxu0 %vm297_vm1, %v1810_v1 }
 0x666   : > { %1723 = vmatmul.mubr.msk.f32.gmra.mxu0 %vm297_vm1, %v1840_v8 }
 0x722   : > { %v1721_v7 = vpop.f32.mrf.mxu0 }
 0x723   : > { %v1249_v1 = vadd.f32 %v1721_v7, %v876_v20 }
 0x724   : > { %v1243_v42 = vpop.f32.mrf.mxu0 }
 0x725   : > { %v1244_v43 = vadd.f32 %v1243_v42, %v871_v22  ;;  %v1263_v45 = vmax.f32 %v1249_v1, 0.0 }
 0x726   : > { %v1724_v8 = vpop.f32.mrf.mxu0 }
 0x727   : > { %v1262_v44 = vmax.f32 %v1244_v43, 0.0  ;;  %v1259_v46 = vadd.f32 %v1724_v8, %v886_v26 }
 0x728   : > { %v1253_v47 = vpop.f32.mrf.mxu0 }
 0x729   : > { %v1254_v48 = vadd.f32 %v1253_v47, %v881_v28  ;;  %1727 = vmatprep.mubr.msk.f32.mxu1 %vm1075_vm6, %v1262_v44  ;;  %v1265_v50 = vmax.f32 %v1259_v46, 0.0 }
 0x72a   : > { %1728 = vmatmul.mubr.msk.f32.vlgmr.msra.gmra.mxu1 %vm1075_vm6, %v1263_v45 }
 0x72b   : > { %v1264_v49 = vmax.f32 %v1254_v48, 0.0 }
 0x72d   : > { %1730 = vmatprep.mubr.msk.f32.mxu1 %vm1075_vm6, %v1264_v49 }
 0x72e   : > { %1731 = vmatmul.mubr.msk.f32.gmra.mxu1 %vm1075_vm6, %v1265_v50 }
 0x7ea   : > { %v1729_v51 = vpop.f32.mrf.mxu1 }
 0x7eb   : > { %v1371_v53 = vmul.f32 %v1729_v51, %v1369_v41 }
 0x7ec   : > { %v1347_v54 = vpop.f32.mrf.mxu1 }
 0x7ed   : > { %v1370_v55 = vmul.f32 %v1369_v41, %v1347_v54  ;;  %v1379_v56 = vadd.f32 %v1376_v52, %v1371_v53 }
 0x7ee   : > { %v1732_v57 = vpop.f32.mrf.mxu1 }
 0x7ef   : > { %v1378_v58 = vadd.f32 %v1376_v52, %v1370_v55  ;;  %v1528_v59 = vmul.f32 -1.442695, %v1379_v56  ;;  %v1373_v60 = vmul.f32 %v1732_v57, %v1369_v41 }
 0x7f0   : > { %v1357_v61 = vpop.f32.mrf.mxu1 }
 0x7f1   : > { %v1527_v62 = vmul.f32 -1.442695, %v1378_v58  ;;  %1750 = vpow2.f32 %v1528_v59  ;;  %v1381_v63 = vadd.f32 %v1376_v52, %v1373_v60  ;;  %v1372_v0 = vmul.f32 %v1369_v41, %v1357_v61 }
 0x7f3   : > { %1752 = vpow2.f32 %v1527_v62  ;;  %v1530_v2 = vmul.f32 -1.442695, %v1381_v63  ;;  %v1380_v3 = vadd.f32 %v1376_v52, %v1372_v0 }
 0x7f5   : > { %1754 = vpow2.f32 %v1530_v2  ;;  %v1529_v4 = vmul.f32 -1.442695, %v1380_v3 }
 0x7f7   : > { %1756 = vpow2.f32 %v1529_v4 }
 0x7fe   : > { %v1751_v5 = vpop.eup %1750 }
 0x7ff   : > { %v1395_v9 = vadd.f32 1.0, %v1751_v5 }
 0x800   : > { %v1753_v10 = vpop.eup %1752 }
 0x801   : > { %v1394_v12 = vadd.f32 1.0, %v1753_v10  ;;  %1758 = vrcp.f32 %v1395_v9 }
 0x802   : > { %v1755_v13 = vpop.eup %1754 }
 0x803   : > { %1760 = vrcp.f32 %v1394_v12  ;;  %v1397_v14 = vadd.f32 1.0, %v1755_v13 }
 0x804   : > { %v1757_v15 = vpop.eup %1756 }
 0x805   : > { %1762 = vrcp.f32 %v1397_v14  ;;  %v1396_v16 = vadd.f32 1.0, %v1757_v15 }
 0x807   : > { %1764 = vrcp.f32 %v1396_v16 }
 0x80e   : > { %v1759_v17 = vpop.eup %1758 }
 0x80f   : > { %1408 = vst.msk [vmem:[%s170_s29 + $0x8] sm:$0xff] %vm1406_vm7, %v1759_v17 }
 0x810   : > { %v1761_v18 = vpop.eup %1760 }
 0x811   : > { %1407 = vst.msk [vmem:[%s170_s29] sm:$0xff] %vm1406_vm7, %v1761_v18 }
 0x812   : > { %v1763_v19 = vpop.eup %1762 }
 0x813   : > { %1410 = vst.msk [vmem:[%s170_s29 + $0x18] sm:$0xff] %vm1406_vm7, %v1763_v19 }
 0x814   : > { %v1765_v6 = vpop.eup %1764 }
 0x815   : > { %1409 = vst.msk [vmem:[%s170_s29 + $0x10] sm:$0xff] %vm1406_vm7, %v1765_v6 }
 0x816 PF: > { %s13_s12 = sadd.s32 1, %s1772_s12  }
 0x817   : > { %p10_p4 = scmp.ge.s32.totalorder %s13_s12, 10  }
 0x819   :  { %12 = sbr.rel (!%p10_p4) target bundleno = 1 (0x1), region = 62 }

</bundles_post_ra>
